<compile_context>
chip_gen: v7x
topology: tpu7x:2x2x1
jax: 0.10.0
libtpu: 0.0.40
codegen_flags: <defaults>
</compile_context>

<pallas_src>
import functools

import jax
import jax.numpy as jnp
from jax import lax
from jax.experimental import pallas as pl
from jax.experimental.pallas import tpu as pltpu

_NEG = float(jnp.finfo(jnp.float32).min)   # max-identity sentinel (never summed)
_PAD = -1e30                               # column padding (finite; A*1e30 << f32 max)


def _vcg_kernel(q_ref,
                rsum_out, max1_out, arg1_out, max2_out, rhead_out,
                rsum_sc, max1_sc, arg1_sc, max2_sc, rhead_sc,
                *, num_agents, tile_n, tiles_per_split):
    A = num_agents
    s = pl.program_id(0)          # split (parallel axis; feeds both TCs on v7x)
    k = pl.program_id(1)          # tile within the split (arbitrary / carried)

    @pl.when(k == 0)
    def _init():
        rsum_sc[...] = jnp.zeros(rsum_sc.shape, rsum_sc.dtype)
        max1_sc[...] = jnp.full(max1_sc.shape, _NEG, max1_sc.dtype)
        max2_sc[...] = jnp.full(max2_sc.shape, _NEG, max2_sc.dtype)
        arg1_sc[...] = jnp.zeros(arg1_sc.shape, arg1_sc.dtype)

    # ---- one fused pass over the A agent rows: running (max, argmax, sum) ----
    # Comparisons stay in the input dtype (bf16 on v6e/v7x); sum accumulates f32.
    row0 = q_ref[pl.ds(0, 1), :]                                   # (1, tile_n)
    carry = (row0,
             jnp.zeros((1, tile_n), jnp.int32),
             row0.astype(jnp.float32))

    def step(a, c):
        cur_max, cur_arg, cur_sum = c
        row = q_ref[pl.ds(a, 1), :]
        better = row > cur_max                    # strict > : first occurrence wins
        return (jnp.where(better, row, cur_max),
                jnp.where(better, a, cur_arg),
                cur_sum + row.astype(jnp.float32))

    if A <= 16:                                   # common case: static unroll
        for a in range(1, A):
            carry = step(a, carry)
    else:                                         # bounded trace / live ranges
        carry = lax.fori_loop(1, A, step, carry)
    _, report, totals = carry                     # (1, tile_n) i32 / f32

    # Padded columns (all agents == -1e30) report agent 0 -> contribute 0.
    rsum_sc[...] += jnp.sum(report, axis=1, keepdims=True)

    # report head (columns 0..A-1) lives entirely in tile 0 since A <= tile_n.
    @pl.when(k == 0)
    def _head():
        rhead_sc[...] = report[:, :A]                               # (1, A) i32

    # ---- running top-2 (value, global arg column) of totals over actions ----
    lane = lax.broadcasted_iota(jnp.int32, (1, tile_n), 1)
    t_max1 = jnp.max(totals, axis=1, keepdims=True)                 # (1, 1)
    t_arg_loc = jnp.min(jnp.where(totals == t_max1, lane, tile_n),
                        axis=1, keepdims=True)                      # (1, 1)
    t_arg1 = t_arg_loc + (s * tiles_per_split + k) * tile_n         # global column
    t_max2 = jnp.max(jnp.where(lane == t_arg_loc, _NEG, totals),
                     axis=1, keepdims=True)                         # (1, 1)

    m1, a1, m2 = max1_sc[...], arg1_sc[...], max2_sc[...]
    keep_old = m1 >= t_max1
    max1_sc[...] = jnp.where(keep_old, m1, t_max1)
    arg1_sc[...] = jnp.where(keep_old, a1, t_arg1)
    max2_sc[...] = jnp.where(keep_old, jnp.maximum(m2, t_max1),
                             jnp.maximum(m1, t_max2))

    # ---- finalize: export this split's partials (merged in the JAX epilogue) ----
    @pl.when(k == pl.num_programs(1) - 1)
    def _fin():
        rsum_out[...] = rsum_sc[...].reshape(1, 1, 1)
        max1_out[...] = max1_sc[...].reshape(1, 1, 1)
        arg1_out[...] = arg1_sc[...].reshape(1, 1, 1)
        max2_out[...] = max2_sc[...].reshape(1, 1, 1)
        rhead_out[...] = rhead_sc[...].reshape(1, 1, A)


def vcg_payments(q: jax.Array, *, max_tile_n: int | None = None,
                 num_splits: int | None = None) -> jax.Array:
    """q: (num_agents A, num_actions N) -> VCG payments (A,) float32."""
    q = jnp.asarray(q)
    if q.ndim != 2:
        q = jnp.squeeze(q)                    # mirror the module's .squeeze()
    A, N = q.shape
    assert 1 <= A <= N, "original module indexes action-length vectors by agent id"
    assert N * max(A - 1, 1) < 2 ** 31, "int32 report-sum accumulator"
    itemsize = jnp.dtype(q.dtype).itemsize

    # --- generation-aware VMEM budget (v7x: 64 MiB phys, v5e/v6e: 128 MiB) ----
    try:
        phys = int(pltpu.get_tpu_info().vmem_capacity_bytes)
    except Exception:
        phys = 64 << 20                       # conservative (v7x-sized) fallback
    stream_budget = int(min(max(phys // 4, 8 << 20), 32 << 20))
    vmem_limit = int(min(phys * 3 // 4, stream_budget + (24 << 20)))

    # --- size tile_n from the byte budget (double-buffered stream + temps) ----
    n_pad128 = -(-N // 128) * 128
    a_pad128 = -(-A // 128) * 128
    bytes_per_col = 2 * A * itemsize + 64
    budget_tile = max(128, (stream_budget // bytes_per_col) // 128 * 128)
    if max_tile_n is not None:
        budget_tile = min(budget_tile, max(128, (max_tile_n // 128) * 128))
    tile_n = min(n_pad128, max(a_pad128, budget_tile))   # always >= A

    tiles_total = -(-n_pad128 // tile_n)
    if num_splits is None:
        num_splits = 2 if tiles_total >= 2 else 1        # feed both TCs on v7x
    num_splits = max(1, min(num_splits, tiles_total))
    tiles_per_split = -(-tiles_total // num_splits)
    total_cols = num_splits * tiles_per_split * tile_n

    if total_cols != N:
        # Padded columns: report agent 0 (adds 0 to rsum), totals = A*(-1e30)
        # (never wins the top-2), so no in-kernel masking is required.
        q = jnp.pad(q, ((0, 0), (0, total_cols - N)), constant_values=_PAD)

    kernel = functools.partial(_vcg_kernel, num_agents=A, tile_n=tile_n,
                               tiles_per_split=tiles_per_split)

    out_shape = (
        jax.ShapeDtypeStruct((num_splits, 1, 1), jnp.int32),    # sum(report)
        jax.ShapeDtypeStruct((num_splits, 1, 1), jnp.float32),  # max1(totals)
        jax.ShapeDtypeStruct((num_splits, 1, 1), jnp.int32),    # arg column of max1
        jax.ShapeDtypeStruct((num_splits, 1, 1), jnp.float32),  # max2 (excl. arg1)
        jax.ShapeDtypeStruct((num_splits, 1, A), jnp.int32),    # report[0:A]
    )
    out_specs = (
        pl.BlockSpec((1, 1, 1), lambda s, k: (s, 0, 0)),
        pl.BlockSpec((1, 1, 1), lambda s, k: (s, 0, 0)),
        pl.BlockSpec((1, 1, 1), lambda s, k: (s, 0, 0)),
        pl.BlockSpec((1, 1, 1), lambda s, k: (s, 0, 0)),
        pl.BlockSpec((1, 1, A), lambda s, k: (s, 0, 0)),
    )

    cost = pl.CostEstimate(flops=3 * A * N, transcendentals=0,
                           bytes_accessed=A * N * itemsize + 16 * num_splits + 4 * A)

    parts = pl.pallas_call(
        kernel,
        out_shape=out_shape,
        grid_spec=pltpu.PrefetchScalarGridSpec(
            num_scalar_prefetch=0,
            grid=(num_splits, tiles_per_split),
            in_specs=[pl.BlockSpec((A, tile_n),
                                   lambda s, k: (0, s * tiles_per_split + k))],
            out_specs=out_specs,
            scratch_shapes=[
                pltpu.VMEM((1, 1), jnp.int32),     # running sum(report)
                pltpu.VMEM((1, 1), jnp.float32),   # max1 of totals
                pltpu.VMEM((1, 1), jnp.int32),     # arg column of max1
                pltpu.VMEM((1, 1), jnp.float32),   # max2 of totals (excl. arg1)
                pltpu.VMEM((1, A), jnp.int32),     # report[0:A]
            ]),
        compiler_params=pltpu.CompilerParams(
            dimension_semantics=("parallel", "arbitrary"),
            vmem_limit_bytes=vmem_limit),
        cost_estimate=cost,
    )(q)

    rsum_p, max1_p, arg1_p, max2_p, rhead_p = parts

    # --- tiny O(A) epilogue: merge per-split partials and form payments -------
    rsum = jnp.sum(rsum_p.reshape(num_splits))
    m1 = max1_p.reshape(num_splits)
    a1 = arg1_p.reshape(num_splits)
    m2 = max2_p.reshape(num_splits)
    g_m1, g_a1, g_m2 = m1[0], a1[0], m2[0]
    for i in range(1, num_splits):
        keep = g_m1 >= m1[i]
        g_m1, g_a1, g_m2 = (jnp.where(keep, g_m1, m1[i]),
                            jnp.where(keep, g_a1, a1[i]),
                            jnp.where(keep, jnp.maximum(g_m2, m1[i]),
                                      jnp.maximum(g_m1, m2[i])))
    rhead = rhead_p[0, 0, :]                                        # (A,) i32
    ext = -jnp.where(jnp.arange(A, dtype=jnp.int32) == g_a1, g_m2, g_m1)
    return (rsum - rhead).astype(jnp.float32) + ext


def vcg_reference(q: jax.Array) -> jax.Array:
    """Pure-JAX reference mirroring the PyTorch forward."""
    q = jnp.asarray(q, jnp.float32)
    A, _ = q.shape
    report = jnp.argmax(q, axis=0)
    totals = jnp.sum(q, axis=0)
    pays = []
    for i in range(A):
        others = jnp.concatenate([totals[:i], totals[i + 1:]])
        pay = (jnp.sum(report) - report[i]).astype(jnp.float32) - jnp.max(others)
        pays.append(pay)
    return jnp.stack(pays)


if __name__ == "__main__":
    # No learnable parameters; `agents` only fixes num_agents.
    key = jax.random.PRNGKey(0)
    k1, k2, k3 = jax.random.split(key, 3)

    # Small shape consistent with the module's (num_agents, num_actions) input.
    A, N = 4, 8
    q = jax.random.normal(k1, (A, N), dtype=jnp.float32)
    out = jax.block_until_ready(vcg_payments(q))
    ref = jax.block_until_ready(vcg_reference(q))
    assert out.shape == (A,)
    assert jnp.allclose(out, ref, atol=1e-5), (out, ref)

    # Multi-tile + 2-way split + column-padding path (grid (2, 3)).
    A2, N2 = 3, 1200
    q2 = jax.random.normal(k2, (A2, N2), dtype=jnp.float32)
    out2 = jax.block_until_ready(vcg_payments(q2, max_tile_n=256))
    ref2 = jax.block_until_ready(vcg_reference(q2))
    assert jnp.allclose(out2, ref2, atol=1e-4), (out2, ref2)

    # bf16 input path (native-dtype compares, f32 totals accumulation).
    A3, N3 = 4, 640
    q3 = jax.random.normal(k3, (A3, N3), dtype=jnp.bfloat16)
    out3 = jax.block_until_ready(vcg_payments(q3, max_tile_n=256))
    ref3 = jax.block_until_ready(vcg_reference(q3))
    assert jnp.allclose(out3, ref3, atol=1e-2, rtol=1e-2), (out3, ref3)

    print("KERNEL_OK")
</pallas_src>

<mosaic_0001>
module attributes {stable_mosaic.version = 11 : i64} {
  func.func @_vcg_kernel(%arg0: i32, %arg1: i32, %arg2: memref<4x128xf32, #tpu.memory_space<vmem>>, %arg3: memref<1x1x1xi32, #tpu.memory_space<vmem>>, %arg4: memref<1x1x1xf32, #tpu.memory_space<vmem>>, %arg5: memref<1x1x1xi32, #tpu.memory_space<vmem>>, %arg6: memref<1x1x1xf32, #tpu.memory_space<vmem>>, %arg7: memref<1x1x4xi32, #tpu.memory_space<vmem>>, %arg8: memref<1x1xi32, #tpu.memory_space<vmem>>, %arg9: memref<1x1xf32, #tpu.memory_space<vmem>>, %arg10: memref<1x1xi32, #tpu.memory_space<vmem>>, %arg11: memref<1x1xf32, #tpu.memory_space<vmem>>, %arg12: memref<1x4xi32, #tpu.memory_space<vmem>>) attributes {dimension_semantics = [#tpu.dimension_semantics<parallel>, #tpu.dimension_semantics<arbitrary>], iteration_bounds = array<i64: 1, 1>, scalar_prefetch = 0 : i64, scratch_operands = 5 : i64, tpu.core_type = #tpu.core_type<tc>, window_params = [{transform_indices = @transform_0, window_bounds = array<i64: 4, 128>}, {transform_indices = @transform_1, window_bounds = array<i64: 1, 1, 1>}, {transform_indices = @transform_2, window_bounds = array<i64: 1, 1, 1>}, {transform_indices = @transform_3, window_bounds = array<i64: 1, 1, 1>}, {transform_indices = @transform_4, window_bounds = array<i64: 1, 1, 1>}, {transform_indices = @transform_5, window_bounds = array<i64: 1, 1, 4>}]} {
    %c0_i32 = arith.constant 0 : i32
    %0 = arith.cmpi eq, %arg1, %c0_i32 : i32
    %1 = arith.extui %0 : i1 to i32
    %c0_i32_0 = arith.constant 0 : i32
    %2 = arith.cmpi ne, %1, %c0_i32_0 : i32
    scf.if %2 {
      %c0_i32_32 = arith.constant 0 : i32
      %65 = vector.broadcast %c0_i32_32 : i32 to vector<1x1xi32>
      %c0_33 = arith.constant 0 : index
      %c0_34 = arith.constant 0 : index
      %66 = vector.load %arg8[%c0_33, %c0_34] : memref<1x1xi32, #tpu.memory_space<vmem>>, vector<1x1xi32>
      tpu.vector_store %arg8[%c0_33, %c0_34], %65 {strides = array<i32>} : memref<1x1xi32, #tpu.memory_space<vmem>>, vector<1x1xi32>,
      %cst_35 = arith.constant -3.40282347E+38 : f32
      %67 = vector.broadcast %cst_35 : f32 to vector<1x1xf32>
      %c0_36 = arith.constant 0 : index
      %c0_37 = arith.constant 0 : index
      %68 = vector.load %arg9[%c0_36, %c0_37] : memref<1x1xf32, #tpu.memory_space<vmem>>, vector<1x1xf32>
      tpu.vector_store %arg9[%c0_36, %c0_37], %67 {strides = array<i32>} : memref<1x1xf32, #tpu.memory_space<vmem>>, vector<1x1xf32>,
      %cst_38 = arith.constant -3.40282347E+38 : f32
      %69 = vector.broadcast %cst_38 : f32 to vector<1x1xf32>
      %c0_39 = arith.constant 0 : index
      %c0_40 = arith.constant 0 : index
      %70 = vector.load %arg11[%c0_39, %c0_40] : memref<1x1xf32, #tpu.memory_space<vmem>>, vector<1x1xf32>
      tpu.vector_store %arg11[%c0_39, %c0_40], %69 {strides = array<i32>} : memref<1x1xf32, #tpu.memory_space<vmem>>, vector<1x1xf32>,
      %c0_i32_41 = arith.constant 0 : i32
      %71 = vector.broadcast %c0_i32_41 : i32 to vector<1x1xi32>
      %c0_42 = arith.constant 0 : index
      %c0_43 = arith.constant 0 : index
      %72 = vector.load %arg10[%c0_42, %c0_43] : memref<1x1xi32, #tpu.memory_space<vmem>>, vector<1x1xi32>
      tpu.vector_store %arg10[%c0_42, %c0_43], %71 {strides = array<i32>} : memref<1x1xi32, #tpu.memory_space<vmem>>, vector<1x1xi32>,
    } else {
    }
    %c0 = arith.constant 0 : index
    %c0_1 = arith.constant 0 : index
    %3 = vector.load %arg2[%c0, %c0_1] : memref<4x128xf32, #tpu.memory_space<vmem>>, vector<1x128xf32>
    %c0_i32_2 = arith.constant 0 : i32
    %4 = vector.broadcast %c0_i32_2 : i32 to vector<1x128xi32>
    %c1 = arith.constant 1 : index
    %c0_3 = arith.constant 0 : index
    %5 = vector.load %arg2[%c1, %c0_3] : memref<4x128xf32, #tpu.memory_space<vmem>>, vector<1x128xf32>
    %6 = arith.cmpf ogt, %5, %3 : vector<1x128xf32>
    %7 = arith.select %6, %5, %3 : vector<1x128xi1>, vector<1x128xf32>
    %c1_i32 = arith.constant 1 : i32
    %8 = vector.broadcast %c1_i32 : i32 to vector<1x128xi32>
    %9 = arith.select %6, %8, %4 : vector<1x128xi1>, vector<1x128xi32>
    %10 = arith.addf %3, %5 : vector<1x128xf32>
    %c2 = arith.constant 2 : index
    %c0_4 = arith.constant 0 : index
    %11 = vector.load %arg2[%c2, %c0_4] : memref<4x128xf32, #tpu.memory_space<vmem>>, vector<1x128xf32>
    %12 = arith.cmpf ogt, %11, %7 : vector<1x128xf32>
    %13 = arith.select %12, %11, %7 : vector<1x128xi1>, vector<1x128xf32>
    %c2_i32 = arith.constant 2 : i32
    %14 = vector.broadcast %c2_i32 : i32 to vector<1x128xi32>
    %15 = arith.select %12, %14, %9 : vector<1x128xi1>, vector<1x128xi32>
    %16 = arith.addf %10, %11 : vector<1x128xf32>
    %c3 = arith.constant 3 : index
    %c0_5 = arith.constant 0 : index
    %17 = vector.load %arg2[%c3, %c0_5] : memref<4x128xf32, #tpu.memory_space<vmem>>, vector<1x128xf32>
    %18 = arith.cmpf ogt, %17, %13 : vector<1x128xf32>
    %c3_i32 = arith.constant 3 : i32
    %19 = vector.broadcast %c3_i32 : i32 to vector<1x128xi32>
    %20 = arith.select %18, %19, %15 : vector<1x128xi1>, vector<1x128xi32>
    %21 = arith.addf %16, %17 : vector<1x128xf32>
    %c0_6 = arith.constant 0 : index
    %c0_7 = arith.constant 0 : index
    %22 = vector.load %arg8[%c0_6, %c0_7] : memref<1x1xi32, #tpu.memory_space<vmem>>, vector<1x1xi32>
    %cst = arith.constant dense<0> : vector<1xi32>
    %23 = vector.multi_reduction <add>, %20, %cst [1] : vector<1x128xi32> to vector<1xi32>
    %24 = vector.shape_cast %23 : vector<1xi32> to vector<1x1xi32>
    %25 = arith.addi %22, %24 : vector<1x1xi32>
    %c0_8 = arith.constant 0 : index
    %c0_9 = arith.constant 0 : index
    %26 = vector.load %arg8[%c0_8, %c0_9] : memref<1x1xi32, #tpu.memory_space<vmem>>, vector<1x1xi32>
    tpu.vector_store %arg8[%c0_8, %c0_9], %25 {strides = array<i32>} : memref<1x1xi32, #tpu.memory_space<vmem>>, vector<1x1xi32>,
    %c0_i32_10 = arith.constant 0 : i32
    %27 = arith.cmpi eq, %arg1, %c0_i32_10 : i32
    %28 = arith.extui %27 : i1 to i32
    %c0_i32_11 = arith.constant 0 : i32
    %29 = arith.cmpi ne, %28, %c0_i32_11 : i32
    scf.if %29 {
      %65 = vector.extract_strided_slice %20 {offsets = [0, 0], sizes = [1, 4], strides = [1, 1]} : vector<1x128xi32> to vector<1x4xi32>
      %c0_32 = arith.constant 0 : index
      %c0_33 = arith.constant 0 : index
      %66 = vector.load %arg12[%c0_32, %c0_33] : memref<1x4xi32, #tpu.memory_space<vmem>>, vector<1x4xi32>
      tpu.vector_store %arg12[%c0_32, %c0_33], %65 {strides = array<i32>} : memref<1x4xi32, #tpu.memory_space<vmem>>, vector<1x4xi32>,
    } else {
    }
    %30 = tpu.iota {dimensions = array<i32: 1>} : vector<1x128xi32>
    %cst_12 = arith.constant dense<0xFF800000> : vector<1xf32>
    %31 = vector.multi_reduction <maximumf>, %21, %cst_12 [1] : vector<1x128xf32> to vector<1xf32>
    %32 = vector.shape_cast %31 : vector<1xf32> to vector<1x1xf32>
    %33 = vector.broadcast %32 : vector<1x1xf32> to vector<1x128xf32>
    %34 = arith.cmpf oeq, %21, %33 : vector<1x128xf32>
    %c128_i32 = arith.constant 128 : i32
    %35 = vector.broadcast %c128_i32 : i32 to vector<1x128xi32>
    %36 = arith.select %34, %30, %35 : vector<1x128xi1>, vector<1x128xi32>
    %cst_13 = arith.constant dense<2147483647> : vector<1xi32>
    %37 = vector.multi_reduction <minsi>, %36, %cst_13 [1] : vector<1x128xi32> to vector<1xi32>
    %38 = vector.shape_cast %37 : vector<1xi32> to vector<1x1xi32>
    %c1_i32_14 = arith.constant 1 : i32
    %39 = arith.muli %arg0, %c1_i32_14 : i32
    %40 = arith.addi %39, %arg1 : i32
    %c128_i32_15 = arith.constant 128 : i32
    %41 = arith.muli %40, %c128_i32_15 : i32
    %42 = vector.broadcast %41 : i32 to vector<1x1xi32>
    %43 = arith.addi %38, %42 : vector<1x1xi32>
    %44 = vector.broadcast %38 : vector<1x1xi32> to vector<1x128xi32>
    %45 = arith.cmpi eq, %30, %44 : vector<1x128xi32>
    %cst_16 = arith.constant -3.40282347E+38 : f32
    %46 = vector.broadcast %cst_16 : f32 to vector<1x128xf32>
    %47 = arith.select %45, %46, %21 : vector<1x128xi1>, vector<1x128xf32>
    %cst_17 = arith.constant dense<0xFF800000> : vector<1xf32>
    %48 = vector.multi_reduction <maximumf>, %47, %cst_17 [1] : vector<1x128xf32> to vector<1xf32>
    %49 = vector.shape_cast %48 : vector<1xf32> to vector<1x1xf32>
    %c0_18 = arith.constant 0 : index
    %c0_19 = arith.constant 0 : index
    %50 = vector.load %arg9[%c0_18, %c0_19] : memref<1x1xf32, #tpu.memory_space<vmem>>, vector<1x1xf32>
    %c0_20 = arith.constant 0 : index
    %c0_21 = arith.constant 0 : index
    %51 = vector.load %arg10[%c0_20, %c0_21] : memref<1x1xi32, #tpu.memory_space<vmem>>, vector<1x1xi32>
    %c0_22 = arith.constant 0 : index
    %c0_23 = arith.constant 0 : index
    %52 = vector.load %arg11[%c0_22, %c0_23] : memref<1x1xf32, #tpu.memory_space<vmem>>, vector<1x1xf32>
    %53 = arith.cmpf oge, %50, %32 : vector<1x1xf32>
    %54 = arith.select %53, %50, %32 : vector<1x1xi1>, vector<1x1xf32>
    %c0_24 = arith.constant 0 : index
    %c0_25 = arith.constant 0 : index
    %55 = vector.load %arg9[%c0_24, %c0_25] : memref<1x1xf32, #tpu.memory_space<vmem>>, vector<1x1xf32>
    tpu.vector_store %arg9[%c0_24, %c0_25], %54 {strides = array<i32>} : memref<1x1xf32, #tpu.memory_space<vmem>>, vector<1x1xf32>,
    %56 = arith.select %53, %51, %43 : vector<1x1xi1>, vector<1x1xi32>
    %c0_26 = arith.constant 0 : index
    %c0_27 = arith.constant 0 : index
    %57 = vector.load %arg10[%c0_26, %c0_27] : memref<1x1xi32, #tpu.memory_space<vmem>>, vector<1x1xi32>
    tpu.vector_store %arg10[%c0_26, %c0_27], %56 {strides = array<i32>} : memref<1x1xi32, #tpu.memory_space<vmem>>, vector<1x1xi32>,
    %58 = arith.maximumf %52, %32 : vector<1x1xf32>
    %59 = arith.maximumf %50, %49 : vector<1x1xf32>
    %60 = arith.select %53, %58, %59 : vector<1x1xi1>, vector<1x1xf32>
    %c0_28 = arith.constant 0 : index
    %c0_29 = arith.constant 0 : index
    %61 = vector.load %arg11[%c0_28, %c0_29] : memref<1x1xf32, #tpu.memory_space<vmem>>, vector<1x1xf32>
    tpu.vector_store %arg11[%c0_28, %c0_29], %60 {strides = array<i32>} : memref<1x1xf32, #tpu.memory_space<vmem>>, vector<1x1xf32>,
    %c0_i32_30 = arith.constant 0 : i32
    %62 = arith.cmpi eq, %arg1, %c0_i32_30 : i32
    %63 = arith.extui %62 : i1 to i32
    %c0_i32_31 = arith.constant 0 : i32
    %64 = arith.cmpi ne, %63, %c0_i32_31 : i32
    scf.if %64 {
      %c0_32 = arith.constant 0 : index
      %c0_33 = arith.constant 0 : index
      %65 = vector.load %arg8[%c0_32, %c0_33] : memref<1x1xi32, #tpu.memory_space<vmem>>, vector<1x1xi32>
      %66 = vector.shape_cast %65 : vector<1x1xi32> to vector<1x1x1xi32>
      %c0_34 = arith.constant 0 : index
      %c0_35 = arith.constant 0 : index
      %c0_36 = arith.constant 0 : index
      %67 = vector.load %arg3[%c0_34, %c0_35, %c0_36] : memref<1x1x1xi32, #tpu.memory_space<vmem>>, vector<1x1x1xi32>
      tpu.vector_store %arg3[%c0_34, %c0_35, %c0_36], %66 {strides = array<i32>} : memref<1x1x1xi32, #tpu.memory_space<vmem>>, vector<1x1x1xi32>,
      %c0_37 = arith.constant 0 : index
      %c0_38 = arith.constant 0 : index
      %68 = vector.load %arg9[%c0_37, %c0_38] : memref<1x1xf32, #tpu.memory_space<vmem>>, vector<1x1xf32>
      %69 = vector.shape_cast %68 : vector<1x1xf32> to vector<1x1x1xf32>
      %c0_39 = arith.constant 0 : index
      %c0_40 = arith.constant 0 : index
      %c0_41 = arith.constant 0 : index
      %70 = vector.load %arg4[%c0_39, %c0_40, %c0_41] : memref<1x1x1xf32, #tpu.memory_space<vmem>>, vector<1x1x1xf32>
      tpu.vector_store %arg4[%c0_39, %c0_40, %c0_41], %69 {strides = array<i32>} : memref<1x1x1xf32, #tpu.memory_space<vmem>>, vector<1x1x1xf32>,
      %c0_42 = arith.constant 0 : index
      %c0_43 = arith.constant 0 : index
      %71 = vector.load %arg10[%c0_42, %c0_43] : memref<1x1xi32, #tpu.memory_space<vmem>>, vector<1x1xi32>
      %72 = vector.shape_cast %71 : vector<1x1xi32> to vector<1x1x1xi32>
      %c0_44 = arith.constant 0 : index
      %c0_45 = arith.constant 0 : index
      %c0_46 = arith.constant 0 : index
      %73 = vector.load %arg5[%c0_44, %c0_45, %c0_46] : memref<1x1x1xi32, #tpu.memory_space<vmem>>, vector<1x1x1xi32>
      tpu.vector_store %arg5[%c0_44, %c0_45, %c0_46], %72 {strides = array<i32>} : memref<1x1x1xi32, #tpu.memory_space<vmem>>, vector<1x1x1xi32>,
      %c0_47 = arith.constant 0 : index
      %c0_48 = arith.constant 0 : index
      %74 = vector.load %arg11[%c0_47, %c0_48] : memref<1x1xf32, #tpu.memory_space<vmem>>, vector<1x1xf32>
      %75 = vector.shape_cast %74 : vector<1x1xf32> to vector<1x1x1xf32>
      %c0_49 = arith.constant 0 : index
      %c0_50 = arith.constant 0 : index
      %c0_51 = arith.constant 0 : index
      %76 = vector.load %arg6[%c0_49, %c0_50, %c0_51] : memref<1x1x1xf32, #tpu.memory_space<vmem>>, vector<1x1x1xf32>
      tpu.vector_store %arg6[%c0_49, %c0_50, %c0_51], %75 {strides = array<i32>} : memref<1x1x1xf32, #tpu.memory_space<vmem>>, vector<1x1x1xf32>,
      %c0_52 = arith.constant 0 : index
      %c0_53 = arith.constant 0 : index
      %77 = vector.load %arg12[%c0_52, %c0_53] : memref<1x4xi32, #tpu.memory_space<vmem>>, vector<1x4xi32>
      %78 = vector.shape_cast %77 : vector<1x4xi32> to vector<1x1x4xi32>
      %c0_54 = arith.constant 0 : index
      %c0_55 = arith.constant 0 : index
      %c0_56 = arith.constant 0 : index
      %79 = vector.load %arg7[%c0_54, %c0_55, %c0_56] : memref<1x1x4xi32, #tpu.memory_space<vmem>>, vector<1x1x4xi32>
      tpu.vector_store %arg7[%c0_54, %c0_55, %c0_56], %78 {strides = array<i32>} : memref<1x1x4xi32, #tpu.memory_space<vmem>>, vector<1x1x4xi32>,
    } else {
    }
    return
  }
  func.func @transform_0(%arg0: i32, %arg1: i32) -> (i32, i32) {
    %c1_i32 = arith.constant 1 : i32
    %0 = arith.muli %arg0, %c1_i32 : i32
    %1 = arith.addi %0, %arg1 : i32
    %c0_i32 = arith.constant 0 : i32
    %c0_i32_0 = arith.constant 0 : i32
    return %c0_i32, %1 : i32, i32
  }
  func.func @transform_1(%arg0: i32, %arg1: i32) -> (i32, i32, i32) {
    %c0_i32 = arith.constant 0 : i32
    %c0_i32_0 = arith.constant 0 : i32
    %c0_i32_1 = arith.constant 0 : i32
    return %arg0, %c0_i32, %c0_i32_0 : i32, i32, i32
  }
  func.func @transform_2(%arg0: i32, %arg1: i32) -> (i32, i32, i32) {
    %c0_i32 = arith.constant 0 : i32
    %c0_i32_0 = arith.constant 0 : i32
    %c0_i32_1 = arith.constant 0 : i32
    return %arg0, %c0_i32, %c0_i32_0 : i32, i32, i32
  }
  func.func @transform_3(%arg0: i32, %arg1: i32) -> (i32, i32, i32) {
    %c0_i32 = arith.constant 0 : i32
    %c0_i32_0 = arith.constant 0 : i32
    %c0_i32_1 = arith.constant 0 : i32
    return %arg0, %c0_i32, %c0_i32_0 : i32, i32, i32
  }
  func.func @transform_4(%arg0: i32, %arg1: i32) -> (i32, i32, i32) {
    %c0_i32 = arith.constant 0 : i32
    %c0_i32_0 = arith.constant 0 : i32
    %c0_i32_1 = arith.constant 0 : i32
    return %arg0, %c0_i32, %c0_i32_0 : i32, i32, i32
  }
  func.func @transform_5(%arg0: i32, %arg1: i32) -> (i32, i32, i32) {
    %c0_i32 = arith.constant 0 : i32
    %c0_i32_0 = arith.constant 0 : i32
    %c0_i32_1 = arith.constant 0 : i32
    return %arg0, %c0_i32, %c0_i32_0 : i32, i32, i32
  }
}

</mosaic_0001>

<bundles_post_ra>
// kernel: tpu_custom_call.1
= control target key start
LH: loop header
LB: loop body
LE: loop exit
PB: predicated region body
PF: predicated region fallthrough
CT: control target
= control target key end

     0   :  { %11 = vsyncpa [#allocation8], 0  ;;  %s509_s0 = inlined_call_operand.hbm [shape: f32[4,128], index: 0, kind: input, shape index: {}]   ;;  %s510_s1 = inlined_call_operand.hbm [shape: s32[1,1,1], index: 1, kind: output, shape index: {0}]   ;;  %s511_s2 = inlined_call_operand.hbm [shape: f32[1,1,1], index: 2, kind: output, shape index: {1}]   ;;  %s512_s3 = inlined_call_operand.hbm [shape: s32[1,1,1], index: 3, kind: output, shape index: {2}]   ;;  %s513_s4 = inlined_call_operand.hbm [shape: f32[1,1,1], index: 4, kind: output, shape index: {3}]   ;;  %s514_s5 = inlined_call_operand.hbm [shape: s32[1,1,4], index: 5, kind: output, shape index: {4}]  }
   0x1   :  { %12 = vsyncpa [#allocation9], 0 }
   0x2   :  { %13 = vsyncpa [#allocation12], 0 }
   0x3   :  { %14 = vsyncpa [#allocation15], 0  ;;  %s353_s18 = smov [#allocation7]   ;;  %s213_s22 = scalar_lea.hbm %s509_s0, 64 }
   0x4   :  { %s24_s19 = sshll.u32 %s353_s18, 4  ;;  %p214_p0 = scmp.ne.s32.totalorder %s509_s0, %s213_s22  ;;  %s25_s19 = int_to_ptr.vmem [resolvable:$true] %s24_s19 }
   0x5   :  { %p217_p1 = scmp.lt.u32.totalorder %s213_s22, %s509_s0 }
   0x7   :  { %p219_p2 = pnand %p217_p1, %p214_p0 }
   0x9   :  { %222 = shalt.err (!%p219_p2)
}
   0xa   :  { %s223_s27 = scalar_lea.vmem %s25_s19, 64  ;;  %p228_p4 = scmp.lt.s32.totalorder %s25_s19, %s25_s19 }
   0xb   :  { %p224_p3 = scmp.ne.s32.totalorder %s25_s19, %s223_s27  ;;  %p229_p5 = scmp.lt.s32.totalorder %s223_s27, %s223_s27 }
   0xd   :  { %p230_p6 = por %p229_p5, %p228_p4 }
   0xf   :  { %p231_p7 = pnand %p230_p6, %p224_p3 }
  0x11   :  { %234 = shalt.err (!%p231_p7)
}
  0x12   :  { %27 = dma.hbm_to_vmem [thread:$0]  %s509_s0, 64, %s25_s19, [#allocation8]  }
  0x13   :  { %345 = dma.done.wait [#allocation8], 64  }
  0x14   :  { %346 = vsyncadd [#allocation8], 4294967232  ;;  %vm36_vm0 = vcmask 0   ;;  %v354_v0 = vmov -3.4028235e+38   ;;  %vm57_vm1 = vcmask 1040384   ;;  %v79_v9 = vlaneseq }
  0x15   :  { %39 = vst.msk [vmem:[#allocation5] sm:$0x1] %vm36_vm0, %v354_v0  ;;  %38 = vst.msk [vmem:[#allocation3] sm:$0x1] %vm36_vm0, %v354_v0  ;;  %v41_v1 = vld [vmem:[#allocation7] sm:$0x1] }
  0x16   :  { %v42_v2 = vld [vmem:[#allocation7 + $0x1] sm:$0x1]  ;;  %v47_v3 = vld [vmem:[#allocation7 + $0x2] sm:$0x1]  ;;  %v52_v5 = vld [vmem:[#allocation7 + $0x3] sm:$0x1] }
  0x17   :  { %v46_v4 = vadd.f32 %v42_v2, %v41_v1  ;;  %v80_v10 = vand.u32 127, %v79_v9  ;;  %vm43_vm5 = vcmp.gt.f32.partialorder %v42_v2, %v41_v1  ;;  %v355_v24 = vmov 0   ;;  %s356_s0 = smov [#allocation11]  }
  0x18   :  { %v44_v23 = vsel %vm43_vm5, %v42_v2, %v41_v1  ;;  %v45_v25 = vsel %vm43_vm5, 1, %v355_v24  ;;  %37 = vst.msk [vmem:[#allocation2] sm:$0x1] %vm36_vm0, %v355_v24  ;;  %40 = vst.msk [vmem:[#allocation4] sm:$0x1] %vm36_vm0, %v355_v24  ;;  %vm77_vm9 = vcmask 24576  }
  0x19   :  { %v51_v6 = vadd.f32 %v47_v3, %v46_v4  ;;  %vm48_vm6 = vcmp.gt.f32.partialorder %v47_v3, %v44_v23  ;;  %s152_s30 = sshll.u32 %s356_s0, 4  ;;  %s153_s30 = int_to_ptr.vmem [resolvable:$true] %s152_s30 }
  0x1a   :  { %v49_v26 = vsel %vm48_vm6, %v47_v3, %v44_v23  ;;  %v50_v27 = vsel %vm48_vm6, 2, %v45_v25  ;;  %s235_s6 = scalar_lea.vmem %s153_s30, 16  ;;  %s239_s7 = scalar_lea.vmem %s153_s30, 32 }
  0x1b   :  { %v55_v7 = vadd.f32 %v52_v5, %v51_v6  ;;  %vm53_vm7 = vcmp.gt.f32.partialorder %v52_v5, %v49_v26  ;;  %p236_p8 = scmp.ne.s32.totalorder %s153_s30, %s235_s6  ;;  %p240_p9 = scmp.lt.s32.totalorder %s153_s30, %s153_s30 }
  0x1c   :  { %v406_v11 = vld [vmem:[#allocation3] sm:$0x1]  ;;  %v54_v28 = vsel %vm53_vm7, 3, %v50_v27  ;;  %p241_p10 = scmp.lt.s32.totalorder %s239_s7, %s235_s6 }
  0x1d   :  { %v81_v8 = vsel %vm57_vm1, %v55_v7, -inf  ;;  %v58_v29 = vsel %vm57_vm1, %v54_v28, 0  ;;  %78 = vst.msk [vmem:[#allocation6] sm:$0x1] %vm77_vm9, %v54_v28 }
  0x1e   :  { %82 = vmax.xlane.f32.xlu0 %v81_v8  ;;  %v60_v30 = vshrl.u32 %v58_v29, 16  ;;  %v59_v32 = vand.u32 65535, %v58_v29  ;;  %p242_p11 = por %p241_p10, %p240_p9 }
  0x1f   :  { %v111_v38 = vld [vmem:[#allocation4] sm:$0x1]  ;;  %v56_v49 = vld [vmem:[#allocation2] sm:$0x1] }
  0x20   :  { %v62_v31 = vcvt.s32.f32 %v60_v30  ;;  %v61_v33 = vcvt.s32.f32 %v59_v32  ;;  %p243_p12 = pnand %p242_p11, %p236_p8 }
  0xab   :  { %v408_v12 = vpop.xlane.xlu0 %82 }
  0xac   :  { %vm84_vm2 = vcmp.eq.f32.partialorder %v55_v7, %v408_v12  ;;  %vm113_vm3 = vcmp.ge.f32.partialorder %v406_v11, %v408_v12 }
  0xad   :  { %v85_v13 = vsel %vm84_vm2, %v80_v10, 128  ;;  %v114_v14 = vsel %vm113_vm3, %v406_v11, %v408_v12 }
  0xae   :  { %v86_v15 = vsel %vm57_vm1, %v85_v13, 2147483647  ;;  %115 = vst.msk [vmem:[#allocation3] sm:$0x1] %vm36_vm0, %v114_v14 }
  0xaf   :  { %v88_v16 = vshra.s32 %v86_v15, 16  ;;  %v87_v19 = vand.u32 65535, %v86_v15 }
  0xb1   :  { %v90_v17 = vcvt.s32.f32 %v88_v16  ;;  %v89_v21 = vcvt.s32.f32 %v87_v19 }
  0xb3   :  { %91 = vmin.xlane.f32.xlu0 %v90_v17 }
  0xb5   :  { %v127_v18 = vld [vmem:[#allocation3] sm:$0x1] }
  0xb6   :  { %128 = vst.msk [vmem:[#allocation11] sm:$0x1] %vm36_vm0, %v127_v18 }
  0xb7   :  { %63 = vadd.xlane.f32.xlu0 %v61_v33 }
 0x140   :  { %v92_v20 = vpop.xlane.xlu0 %91 }
 0x141   :  { %vm93_vm4 = vcmp.eq.f32.partialorder %v90_v17, %v92_v20  ;;  %v98_v34 = vcvt.f32.s32 %v92_v20 }
 0x142   :  { %v94_v22 = vsel %vm93_vm4, %v89_v21, inf }
 0x143   :  { %95 = vmin.xlane.f32.xlu1 %v94_v22  ;;  %v99_v36 = vshll.u32 %v98_v34, 16 }
 0x144   :  { %v64_v46 = vpop.xlane.xlu0 %63 }
 0x145   :  { %v67_v48 = vcvt.f32.s32 %v64_v46 }
 0x147   :  { %65 = vadd.xlane.f32.xlu1 %v62_v31 }
 0x1d0   :  { %v96_v35 = vpop.xlane.xlu1 %95 }
 0x1d1   :  { %v97_v37 = vcvt.f32.s32 %v96_v35 }
 0x1d3   :  { %v100_v39 = vadd.s32 %v99_v36, %v97_v37 }
 0x1d4   :  { %v66_v44 = vpop.xlane.xlu1 %65 }
 0x1d5   :  { %vm105_vm8 = vcmp.eq.s32.totalorder %v80_v10, %v100_v39  ;;  %v116_v40 = vsel %vm113_vm3, %v111_v38, %v100_v39  ;;  %v68_v45 = vcvt.f32.s32 %v66_v44 }
 0x1d6   :  { %v106_v41 = vsel %vm105_vm8, -3.4028235e+38, %v55_v7  ;;  %117 = vst.msk [vmem:[#allocation4] sm:$0x1] %vm36_vm0, %v116_v40 }
 0x1d7   :  { %v107_v42 = vsel %vm57_vm1, %v106_v41, -inf  ;;  %v69_v47 = vshll.u32 %v68_v45, 16 }
 0x1d8   :  { %108 = vmax.xlane.f32.xlu1 %v107_v42 }
 0x1d9   :  { %v70_v50 = vadd.s32 %v69_v47, %v67_v48 }
 0x1db   :  { %v71_v51 = vadd.s32 %v70_v50, %v56_v49 }
 0x1dd   :  { %v129_v43 = vld [vmem:[#allocation4] sm:$0x1]  ;;  %73 = vst.msk [vmem:[#allocation2] sm:$0x1] %vm36_vm0, %v71_v51 }
 0x1de   :  { %130 = vst.msk [vmem:[#allocation13] sm:$0x1] %vm36_vm0, %v129_v43 }
 0x1df   :  { %246 = shalt.err (!%p243_p12)
}
 0x1e0   :  { %s247_s10 = scalar_lea.hbm %s511_s2, 16 }
 0x1e1   :  { %p248_p13 = scmp.ne.s32.totalorder %s511_s2, %s247_s10  ;;  %p251_p0 = scmp.lt.u32.totalorder %s247_s10, %s511_s2 }
 0x1e3   :  { %p253_p1 = pnand %p251_p0, %p248_p13 }
 0x1e5   :  { %256 = shalt.err (!%p253_p1)
}
 0x1e6   :  { %155 = dma.vmem_to_hbm [thread:$0]  %s153_s30, 16, %s511_s2, [#allocation12]   ;;  %v125_v52 = vld [vmem:[#allocation2] sm:$0x1]  ;;  %v133_v53 = vld [vmem:[#allocation6] sm:$0x1] }
 0x1e7   :  { %s357_s17 = smov [#allocation10]   ;;  %126 = vst.msk [vmem:[#allocation10] sm:$0x1] %vm36_vm0, %v125_v52 }
 0x1e8   :  { %s142_s18 = sshll.u32 %s357_s17, 4  ;;  %135 = vst.msk [vmem:[#allocation16] sm:$0x1] %vm77_vm9, %v133_v53  ;;  %s143_s18 = int_to_ptr.vmem [resolvable:$true] %s142_s18 }
 0x1e9   :  { %s257_s19 = scalar_lea.vmem %s143_s18, 16  ;;  %s261_s20 = scalar_lea.vmem %s143_s18, 32 }
 0x1ea   :  { %p258_p2 = scmp.ne.s32.totalorder %s143_s18, %s257_s19  ;;  %p262_p3 = scmp.lt.s32.totalorder %s143_s18, %s143_s18 }
 0x1eb   :  { %p263_p4 = scmp.lt.s32.totalorder %s261_s20, %s257_s19 }
 0x1ed   :  { %p264_p5 = por %p263_p4, %p262_p3 }
 0x1ef   :  { %p265_p6 = pnand %p264_p5, %p258_p2 }
 0x1f1   :  { %268 = shalt.err (!%p265_p6)
}
 0x1f2   :  { %s269_s2 = scalar_lea.hbm %s510_s1, 16 }
 0x1f3   :  { %p270_p7 = scmp.ne.s32.totalorder %s510_s1, %s269_s2  ;;  %p273_p8 = scmp.lt.u32.totalorder %s269_s2, %s510_s1 }
 0x1f5   :  { %p275_p9 = pnand %p273_p8, %p270_p7 }
 0x1f7   :  { %278 = shalt.err (!%p275_p9)
}
 0x1f8   :  { %145 = dma.vmem_to_hbm [thread:$0]  %s143_s18, 16, %s510_s1, [#allocation9]  }
 0x1f9   :  { %s358_s29 = smov [#allocation13]  }
 0x1fa   :  { %s162_s0 = sshll.u32 %s358_s29, 4  ;;  %s163_s0 = int_to_ptr.vmem [resolvable:$true] %s162_s0 }
 0x1fb   :  { %s279_s30 = scalar_lea.vmem %s163_s0, 16  ;;  %s283_s6 = scalar_lea.vmem %s163_s0, 32 }
 0x1fc   :  { %p280_p10 = scmp.ne.s32.totalorder %s163_s0, %s279_s30  ;;  %p284_p11 = scmp.lt.s32.totalorder %s163_s0, %s163_s0 }
 0x1fd   :  { %p285_p12 = scmp.lt.s32.totalorder %s283_s6, %s279_s30 }
 0x1ff   :  { %p286_p13 = por %p285_p12, %p284_p11 }
 0x201   :  { %p287_p0 = pnand %p286_p13, %p280_p10 }
 0x203   :  { %290 = shalt.err (!%p287_p0)
}
 0x204   :  { %s291_s9 = scalar_lea.hbm %s512_s3, 16 }
 0x205   :  { %p292_p1 = scmp.ne.s32.totalorder %s512_s3, %s291_s9  ;;  %p295_p2 = scmp.lt.u32.totalorder %s291_s9, %s512_s3 }
 0x207   :  { %p297_p3 = pnand %p295_p2, %p292_p1 }
 0x209   :  { %300 = shalt.err (!%p297_p3)
}
 0x20a   :  { %165 = dma.vmem_to_hbm [thread:$0]  %s163_s0, 16, %s512_s3, [#allocation12]   ;;  %v112_v54 = vld [vmem:[#allocation5] sm:$0x1] }
 0x20b   :  { %v118_v56 = vmax.f32 %v112_v54, %v408_v12  ;;  %s359_s15 = smov [#allocation14]   ;;  %s360_s17 = smov [#allocation16]  }
 0x20c   :  { %s172_s16 = sshll.u32 %s359_s15, 4  ;;  %s182_s18 = sshll.u32 %s360_s17, 4  ;;  %s173_s16 = int_to_ptr.vmem [resolvable:$true] %s172_s16  ;;  %s476_s18 = int_to_ptr.vmem [resolvable:$true] %s182_s18 }
 0x20d   :  { %s301_s3 = scalar_lea.vmem %s173_s16, 16  ;;  %s305_s19 = scalar_lea.vmem %s173_s16, 32 }
 0x20e   :  { %p302_p4 = scmp.ne.s32.totalorder %s173_s16, %s301_s3  ;;  %p306_p5 = scmp.lt.s32.totalorder %s173_s16, %s173_s16 }
 0x20f   :  { %p307_p6 = scmp.lt.s32.totalorder %s305_s19, %s301_s3 }
 0x211   :  { %p308_p7 = por %p307_p6, %p306_p5 }
 0x213   :  { %p309_p8 = pnand %p308_p7, %p302_p4 }
 0x265   :  { %v109_v55 = vpop.xlane.xlu1 %108 }
 0x266   :  { %v119_v57 = vmax.f32 %v406_v11, %v109_v55 }
 0x268   :  { %v120_v58 = vsel %vm113_vm3, %v118_v56, %v119_v57 }
 0x269   :  { %121 = vst.msk [vmem:[#allocation5] sm:$0x1] %vm36_vm0, %v120_v58 }
 0x270   :  { %v131_v59 = vld [vmem:[#allocation5] sm:$0x1] }
 0x271   :  { %132 = vst.msk [vmem:[#allocation14] sm:$0x1] %vm36_vm0, %v131_v59 }
 0x272   :  { %312 = shalt.err (!%p309_p8)
}
 0x273   :  { %s313_s22 = scalar_lea.hbm %s513_s4, 16 }
 0x274   :  { %p314_p9 = scmp.ne.s32.totalorder %s513_s4, %s313_s22  ;;  %p317_p10 = scmp.lt.u32.totalorder %s313_s22, %s513_s4 }
 0x276   :  { %p319_p11 = pnand %p317_p10, %p314_p9 }
 0x278   :  { %322 = shalt.err (!%p319_p11)
}
 0x279   :  { %175 = dma.vmem_to_hbm [thread:$0]  %s173_s16, 16, %s513_s4, [#allocation15]  }
 0x27a   :  { %s323_s28 = scalar_lea.vmem %s476_s18, 16  ;;  %s327_s29 = scalar_lea.vmem %s476_s18, 32 }
 0x27b   :  { %p324_p12 = scmp.ne.s32.totalorder %s476_s18, %s323_s28  ;;  %p328_p13 = scmp.lt.s32.totalorder %s476_s18, %s476_s18 }
 0x27c   :  { %p329_p0 = scmp.lt.s32.totalorder %s327_s29, %s323_s28 }
 0x27e   :  { %p330_p1 = por %p329_p0, %p328_p13 }
 0x280   :  { %p331_p2 = pnand %p330_p1, %p324_p12 }
 0x282   :  { %334 = shalt.err (!%p331_p2)
}
 0x283   :  { %s335_s6 = scalar_lea.hbm %s514_s5, 16 }
 0x284   :  { %p336_p3 = scmp.ne.s32.totalorder %s514_s5, %s335_s6  ;;  %p339_p4 = scmp.lt.u32.totalorder %s335_s6, %s514_s5 }
 0x286   :  { %p341_p5 = pnand %p339_p4, %p336_p3 }
 0x288   :  { %344 = shalt.err (!%p341_p5)
}
 0x289   :  { %185 = dma.vmem_to_hbm [thread:$0]  %s476_s18, 16, %s514_s5, [#allocation15]  }
 0x28a   :  { %347 = dma.done.wait [#allocation9], 16  }
 0x28b   :  { %348 = vsyncadd [#allocation9], 4294967280 }
 0x28c   :  { %349 = dma.done.wait [#allocation12], 32  }
 0x28d   :  { %350 = vsyncadd [#allocation12], 4294967264 }
 0x28e   :  { %351 = dma.done.wait [#allocation15], 32  }
 0x28f   :  { %352 = vsyncadd [#allocation15], 4294967264 }
 0x290   :  { %201 = vsyncpa [#allocation8], 1 }
 0x291   :  { %202 = vsyncpa [#allocation9], 1 }
 0x292   :  { %203 = vsyncpa [#allocation12], 1 }
 0x293   :  { %204 = vsyncpa [#allocation15], 1 }

</bundles_post_ra>
